<compile_context>
chip_gen: v7x
topology: tpu7x:2x2x1
jax: 0.10.0
libtpu: 0.0.40
codegen_flags: <defaults>
</compile_context>

<pallas_src>
import jax
import jax.numpy as jnp
from jax.experimental import pallas as pl
from jax.experimental.pallas import tpu as pltpu


def _linear_hardswish_kernel(x_ref, wt_ref, b_ref, o_ref):
    # x: (tm, IN), wt: (IN, OUT) [pre-transposed], b: (1, OUT), o: (tm, OUT)
    v1 = jnp.dot(x_ref[...], wt_ref[...],
                 preferred_element_type=jnp.float32) + b_ref[...]
    # hardswish: v1 * clamp(v1 + 3, 0, 6) / 6
    v2 = v1 * jnp.clip(v1 + 3.0, 0.0, 6.0)
    o_ref[...] = (v2 * (1.0 / 6.0)).astype(o_ref.dtype)


def prepare_params(weight, bias):
    """One-time parameter prep (hoisted out of the per-call path).

    weight: (OUT, IN) nn.Linear layout -> (IN, OUT) so the MXU contracts on the
    native layout (no in-kernel transpose); bias: (OUT,) -> (1, OUT)."""
    return weight.T, bias.reshape(1, -1)


def linear_hardswish(x, wt, b2, *, tm_max=1024):
    """x: (B, IN) f32, wt: (IN, OUT) f32 (pre-transposed), b2: (1, OUT) f32
    -> (B, OUT) f32."""
    B, IN = x.shape
    OUT = wt.shape[1]

    # Row tile: multiple of 8, capped; ragged last block handled by Pallas
    # (no cross-row reduction, so OOB rows are simply discarded on store).
    tm = min(tm_max, 8 * pl.cdiv(B, 8))
    grid = (pl.cdiv(B, tm),)

    return pl.pallas_call(
        _linear_hardswish_kernel,
        out_shape=jax.ShapeDtypeStruct((B, OUT), x.dtype),
        grid=grid,
        in_specs=[
            pl.BlockSpec((tm, IN), lambda i: (i, 0)),    # streamed activation rows
            pl.BlockSpec((IN, OUT), lambda i: (0, 0)),   # resident (pre-transposed) weight
            pl.BlockSpec((1, OUT), lambda i: (0, 0)),    # resident bias
        ],
        out_specs=pl.BlockSpec((tm, OUT), lambda i: (i, 0)),
        compiler_params=pltpu.CompilerParams(
            dimension_semantics=("parallel",)),
    )(x, wt, b2)


def _reference(x, weight, bias):
    v1 = x @ weight.T + bias
    v2 = v1 * jnp.clip(v1 + 3.0, 0.0, 6.0)
    return v2 / 6.0


if __name__ == "__main__":
    key = jax.random.PRNGKey(0)
    kx, kw, kb = jax.random.split(key, 3)

    B, IN, OUT = 3, 10, 10
    x1 = jax.random.normal(kx, (B, IN), dtype=jnp.float32)

    # Deterministic nn.Linear-style init: U(-1/sqrt(in), 1/sqrt(in))
    bound = 1.0 / (IN ** 0.5)
    weight = jax.random.uniform(kw, (OUT, IN), jnp.float32, -bound, bound)
    bias = jax.random.uniform(kb, (OUT,), jnp.float32, -bound, bound)

    # One-time parameter preparation (not on the per-call path).
    wt, b2 = prepare_params(weight, bias)
    wt, b2 = jax.block_until_ready(wt), jax.block_until_ready(b2)

    out = jax.block_until_ready(linear_hardswish(x1, wt, b2))

    ref = _reference(x1, weight, bias)
    assert out.shape == (B, OUT)
    assert jnp.allclose(out, ref, atol=1e-5, rtol=1e-5), "mismatch vs reference"
    print("KERNEL_OK")
</pallas_src>

<mosaic_0001>
module attributes {stable_mosaic.version = 11 : i64} {
  func.func @_linear_hardswish_kernel(%arg0: i32, %arg1: memref<8x10xf32, #tpu.memory_space<vmem>>, %arg2: memref<10x10xf32, #tpu.memory_space<vmem>>, %arg3: memref<1x10xf32, #tpu.memory_space<vmem>>, %arg4: memref<8x10xf32, #tpu.memory_space<vmem>>) attributes {dimension_semantics = [#tpu.dimension_semantics<parallel>], iteration_bounds = array<i64: 1>, scalar_prefetch = 0 : i64, scratch_operands = 0 : i64, tpu.core_type = #tpu.core_type<tc>, window_params = [{transform_indices = @transform_0, window_bounds = array<i64: 8, 10>}, {pipeline_mode = #tpu.pipeline_mode<synchronous>, transform_indices = @transform_1, window_bounds = array<i64: 10, 10>}, {pipeline_mode = #tpu.pipeline_mode<synchronous>, transform_indices = @transform_2, window_bounds = array<i64: 1, 10>}, {transform_indices = @transform_3, window_bounds = array<i64: 8, 10>}]} {
    %c0 = arith.constant 0 : index
    %c0_0 = arith.constant 0 : index
    %0 = vector.load %arg1[%c0, %c0_0] : memref<8x10xf32, #tpu.memory_space<vmem>>, vector<8x10xf32>
    %c0_1 = arith.constant 0 : index
    %c0_2 = arith.constant 0 : index
    %1 = vector.load %arg2[%c0_1, %c0_2] : memref<10x10xf32, #tpu.memory_space<vmem>>, vector<10x10xf32>
    %cst = arith.constant dense<0.000000e+00> : vector<8x10xf32>
    %2 = tpu.matmul %0, %1, %cst {dimension_numbers = #tpu.dot_dimension_numbers<[1], [0], [0], [1], [0, 0, 1, 1], [], []>} : vector<8x10xf32>, vector<10x10xf32>, vector<8x10xf32> -> vector<8x10xf32>
    %c0_3 = arith.constant 0 : index
    %c0_4 = arith.constant 0 : index
    %3 = vector.load %arg3[%c0_3, %c0_4] : memref<1x10xf32, #tpu.memory_space<vmem>>, vector<1x10xf32>
    %4 = vector.broadcast %3 : vector<1x10xf32> to vector<8x10xf32>
    %5 = arith.addf %2, %4 : vector<8x10xf32>
    %cst_5 = arith.constant 3.000000e+00 : f32
    %6 = vector.broadcast %cst_5 : f32 to vector<8x10xf32>
    %7 = arith.addf %5, %6 : vector<8x10xf32>
    %cst_6 = arith.constant 0.000000e+00 : f32
    %cst_7 = arith.constant 6.000000e+00 : f32
    %8 = vector.broadcast %cst_6 : f32 to vector<8x10xf32>
    %9 = arith.maximumf %8, %7 : vector<8x10xf32>
    %10 = vector.broadcast %cst_7 : f32 to vector<8x10xf32>
    %11 = arith.minimumf %10, %9 : vector<8x10xf32>
    %12 = arith.mulf %5, %11 : vector<8x10xf32>
    %cst_8 = arith.constant 0.166666672 : f32
    %13 = vector.broadcast %cst_8 : f32 to vector<8x10xf32>
    %14 = arith.mulf %12, %13 : vector<8x10xf32>
    %c0_9 = arith.constant 0 : index
    %c0_10 = arith.constant 0 : index
    %15 = vector.load %arg4[%c0_9, %c0_10] : memref<8x10xf32, #tpu.memory_space<vmem>>, vector<8x10xf32>
    tpu.vector_store %arg4[%c0_9, %c0_10], %14 {strides = array<i32>} : memref<8x10xf32, #tpu.memory_space<vmem>>, vector<8x10xf32>,
    return
  }
  func.func @transform_0(%arg0: i32) -> (i32, i32) {
    %c0_i32 = arith.constant 0 : i32
    %c0_i32_0 = arith.constant 0 : i32
    return %arg0, %c0_i32 : i32, i32
  }
  func.func @transform_1(%arg0: i32) -> (i32, i32) {
    %c0_i32 = arith.constant 0 : i32
    %c0_i32_0 = arith.constant 0 : i32
    %c0_i32_1 = arith.constant 0 : i32
    return %c0_i32, %c0_i32_0 : i32, i32
  }
  func.func @transform_2(%arg0: i32) -> (i32, i32) {
    %c0_i32 = arith.constant 0 : i32
    %c0_i32_0 = arith.constant 0 : i32
    %c0_i32_1 = arith.constant 0 : i32
    return %c0_i32, %c0_i32_0 : i32, i32
  }
  func.func @transform_3(%arg0: i32) -> (i32, i32) {
    %c0_i32 = arith.constant 0 : i32
    %c0_i32_0 = arith.constant 0 : i32
    return %arg0, %c0_i32 : i32, i32
  }
}

</mosaic_0001>

<bundles_post_ra>
// kernel: tpu_custom_call.1
= control target key start
LH: loop header
LB: loop body
LE: loop exit
PB: predicated region body
PF: predicated region fallthrough
CT: control target
= control target key end

     0   :  { %8 = vsyncpa [#allocation3], 0  ;;  %s331_s0 = inlined_call_operand.hbm [shape: f32[3,10], index: 0, kind: input, shape index: {}]   ;;  %s332_s1 = inlined_call_operand.hbm [shape: f32[10,10], index: 1, kind: input, shape index: {}]   ;;  %s333_s2 = inlined_call_operand.vmem [shape: f32[1,10], index: 2, kind: input, shape index: {}]   ;;  %s334_s3 = inlined_call_operand.hbm [shape: f32[3,10], index: 3, kind: output, shape index: {}]  }
   0x1   :  { %9 = vsyncpa [#allocation6], 0 }
   0x2   :  { %10 = vsyncpa [#allocation4], 0 }
   0x3   :  { %15 = vsyncadd [#allocation3], 64  ;;  %s255_s12 = smov [#allocation2]   ;;  %s183_s16 = scalar_lea.hbm %s331_s0, 64 }
   0x4   :  { %s16_s13 = sshll.u32 %s255_s12, 4  ;;  %p184_p0 = scmp.ne.s32.totalorder %s331_s0, %s183_s16  ;;  %s17_s13 = int_to_ptr.vmem [resolvable:$true] %s16_s13 }
   0x5   :  { %p187_p1 = scmp.lt.u32.totalorder %s183_s16, %s331_s0 }
   0x7   :  { %p189_p2 = pnand %p187_p1, %p184_p0 }
   0x9   :  { %192 = shalt.err (!%p189_p2)
}
   0xa   :  { %s193_s21 = scalar_lea.vmem %s17_s13, 64  ;;  %s197_s22 = scalar_lea.vmem %s17_s13, 128 }
   0xb   :  { %p194_p3 = scmp.ne.s32.totalorder %s17_s13, %s193_s21  ;;  %p198_p4 = scmp.lt.s32.totalorder %s17_s13, %s17_s13 }
   0xc   :  { %p199_p5 = scmp.lt.s32.totalorder %s197_s22, %s193_s21 }
   0xe   :  { %p200_p6 = por %p199_p5, %p198_p4 }
  0x10   :  { %p201_p7 = pnand %p200_p6, %p194_p3 }
  0x12   :  { %204 = shalt.err (!%p201_p7)
}
  0x13   :  { %s256_s23 = smov 64   ;;  %s257_s24 = smov 4  }
  0x14   :  { %22 = dma.hbm_to_vmem [thread:$0]  %s331_s0, 64, %s17_s13, [#allocation3], %s256_s23, %s256_s23, %s257_s24  }
  0x15   :  { %s258_s27 = smov [#allocation5]   ;;  %s205_s4 = scalar_lea.hbm %s332_s1, 256 }
  0x16   :  { %s28_s28 = sshll.u32 %s258_s27, 4  ;;  %p206_p8 = scmp.ne.s32.totalorder %s332_s1, %s205_s4  ;;  %s29_s28 = int_to_ptr.vmem [resolvable:$true] %s28_s28 }
  0x17   :  { %p209_p9 = scmp.lt.u32.totalorder %s205_s4, %s332_s1 }
  0x19   :  { %p211_p10 = pnand %p209_p9, %p206_p8 }
  0x1b   :  { %214 = shalt.err (!%p211_p10)
}
  0x1c   :  { %s215_s9 = scalar_lea.vmem %s29_s28, 256  ;;  %p220_p12 = scmp.lt.s32.totalorder %s29_s28, %s29_s28 }
  0x1d   :  { %p216_p11 = scmp.ne.s32.totalorder %s29_s28, %s215_s9  ;;  %p221_p13 = scmp.lt.s32.totalorder %s215_s9, %s215_s9 }
  0x1f   :  { %p222_p0 = por %p221_p13, %p220_p12 }
  0x21   :  { %p223_p1 = pnand %p222_p0, %p216_p11 }
  0x23   :  { %226 = shalt.err (!%p223_p1)
}
  0x24   :  { %s259_s0 = smov 128   ;;  %s260_s10 = smov 8  }
  0x25   :  { %34 = dma.hbm_to_vmem [thread:$0]  %s332_s1, 256, %s29_s28, [#allocation6], %s259_s0, %s259_s0, %s260_s10  }
  0x26   :  { %249 = dma.done.wait [#allocation3], 128  }
  0x27   :  { %250 = vsyncadd [#allocation3], 4294967168 }
  0x28   :  { %251 = dma.done.wait [#allocation6], 256  }
  0x29   :  { %252 = vsyncadd [#allocation6], 4294967040  ;;  %v261_v0 = vmov 0.0|0.0   ;;  %vm262_vm0 = vmmov 0   ;;  %v263_v1 = vmov 0.0   ;;  %vm57_vm1 = vcmask 1041408  }
  0x2a   :  { %168 = vmatprep.subr.bf16.mxu0 %v261_v0  ;;  %165 = vmatprep.mubr.msk.f32.mxu0 %vm262_vm0, %v263_v1  ;;  %v44_v2 = vld [vmem:[#allocation5] sm:$0xff]  ;;  %v45_v3 = vld [vmem:[#allocation5 + $0x8] sm:$0x3]  ;;  %vm264_vm2 = vmmov 1   ;;  %v43_v5 = vld [vmem:[#allocation2] sm:$0xff]  ;;  %vm53_vm4 = vcmask 80896  }
  0x2b   :  { %vm170_vm3 = vmpackc.low %vm57_vm1, %vm264_vm2  ;;  %v169_v4 = vpack.c.bf16 %v45_v3, %v44_v2  ;;  %v155_v6 = vld [vmem:[%s333_s2] ss:$0 sm:$0xff] }
  0x2d   :  { %171 = vmatpush3.bf16.msk.msra.mxu0 %vm170_vm3, %v169_v4 }
  0x30   :  { %166 = vmatmul.mubr.msk.f32.vlgmr.msra.gmra.mrb[0].mxu0 %vm53_vm4, %v43_v5 }
 0x103   :  { %v127_v7 = vpop.f32.mrb[0].mxu0 }
 0x104   :  { %v128_v8 = vadd.f32 %v155_v6, %v127_v7  ;;  %v167_v9 = vpop.f32.mrb[1].mxu0 }
 0x106   :  { %v131_v10 = vadd.f32 3.0, %v128_v8 }
 0x108   :  { %v132_v11 = vmax.f32 %v131_v10, 0.0 }
 0x10a   :  { %v133_v12 = vmin.f32 %v132_v11, 6.0 }
 0x10c   :  { %v134_v13 = vmul.f32 %v133_v12, %v128_v8 }
 0x10e   :  { %v135_v14 = vmul.f32 0.16666667, %v134_v13 }
 0x110   :  { %136 = vst.msk [vmem:[#allocation7] sm:$0xff] %vm53_vm4, %v135_v14 }
 0x111   :  { %141 = vsyncadd [#allocation4], 64  ;;  %s265_s14 = smov [#allocation7]  }
 0x112   :  { %s142_s15 = sshll.u32 %s265_s14, 4  ;;  %s143_s15 = int_to_ptr.vmem [resolvable:$true] %s142_s15 }
 0x113   :  { %s227_s16 = scalar_lea.vmem %s143_s15, 64  ;;  %s231_s17 = scalar_lea.vmem %s143_s15, 128 }
 0x114   :  { %p228_p2 = scmp.ne.s32.totalorder %s143_s15, %s227_s16  ;;  %p232_p3 = scmp.lt.s32.totalorder %s143_s15, %s143_s15 }
 0x115   :  { %p233_p4 = scmp.lt.s32.totalorder %s231_s17, %s227_s16 }
 0x117   :  { %p234_p5 = por %p233_p4, %p232_p3 }
 0x119   :  { %p235_p6 = pnand %p234_p5, %p228_p2 }
 0x11b   :  { %238 = shalt.err (!%p235_p6)
}
 0x11c   :  { %s239_s19 = scalar_lea.hbm %s334_s3, 64 }
 0x11d   :  { %p240_p7 = scmp.ne.s32.totalorder %s334_s3, %s239_s19  ;;  %p243_p8 = scmp.lt.u32.totalorder %s239_s19, %s334_s3 }
 0x11f   :  { %p245_p9 = pnand %p243_p8, %p240_p7 }
 0x121   :  { %248 = shalt.err (!%p245_p9)
}
 0x122   :  { %148 = dma.vmem_to_hbm [thread:$0]  %s143_s15, 64, %s334_s3, [#allocation4], %s256_s23, %s256_s23, %s257_s24  }
 0x123   :  { %253 = dma.done.wait [#allocation4], 128  }
 0x124   :  { %254 = vsyncadd [#allocation4], 4294967168 }
 0x125   :  { %152 = vsyncpa [#allocation3], 1 }
 0x126   :  { %153 = vsyncpa [#allocation6], 1 }
 0x127   :  { %154 = vsyncpa [#allocation4], 1 }

</bundles_post_ra>
